<compile_context>
chip_gen: v6e
topology: v6e:2x2x1
jax: 0.10.0
libtpu: 0.0.40
codegen_flags: <defaults>
</compile_context>

<pallas_src>
import jax
import jax.numpy as jnp
from jax.experimental import pallas as pl
from jax.experimental.pallas import tpu as pltpu


_VMEM_DATA_BUDGET = 40 * 1024 * 1024   # tile-sizing budget (fits v7x's 64 MiB VMEM)
_VMEM_LIMIT_BYTES = 48 * 1024 * 1024   # scoped-VMEM limit handed to Mosaic


def _round_up(x, m):
    return (x + m - 1) // m * m


def _film_kernel(x_ref, cond_ref, wg_ref, wb_ref, bg_ref, bb_ref, o_ref):
    cond = cond_ref[...]
    x = x_ref[...].astype(jnp.float32)
    # Two (tm, D) MXU matmuls with f32 accumulation; no (tm, 2D) intermediate
    # and no lane-axis slicing of the projection.
    gamma = jnp.dot(cond, wg_ref[...], preferred_element_type=jnp.float32)
    beta = jnp.dot(cond, wb_ref[...], preferred_element_type=jnp.float32)
    gamma = gamma + bg_ref[...]          # (tm, D) + (1, D) broadcast
    beta = beta + bb_ref[...]
    o_ref[...] = (gamma * x + beta).astype(o_ref.dtype)


def _choose_tile_m(M, D_pad, stream_itemsizes, weight_bytes, requested):
    """Largest row tile (multiple of 8) whose streams fit the VMEM budget."""
    per_row = D_pad * 2 * sum(stream_itemsizes)   # double-buffered x, cond, out
    avail = max(_VMEM_DATA_BUDGET - weight_bytes, 8 * per_row)
    tm = min(int(requested), int(avail // per_row))
    tm = max(8, (tm // 8) * 8)
    if tm >= M:
        # Either one full block, or split in two so both v7x TensorCores get work.
        tm = _round_up(pl.cdiv(M, 2), 8) if M >= 16 else M
    return tm


def film_forward(x, conditioning, weight, bias, *, tile_m=1024, compute_dtype=None):
    """FiLM forward.

    x, conditioning : [B, T, D]
    weight          : [D, 2*D]  (proj = cond @ weight + bias, i.e. the
                                 transpose of torch.nn.Linear's [2D, D] weight)
    bias            : [2*D]
    compute_dtype   : optional MXU-operand dtype for cond/weights
                      (e.g. jnp.bfloat16 on v6e/v7x); accumulation stays f32.
    """
    B, T, D = x.shape
    M = B * T
    D_pad = _round_up(D, 128)

    x2 = x.reshape(M, D)
    c2 = conditioning.reshape(M, D)
    w_gamma = weight[:, :D]
    w_beta = weight[:, D:]
    b_gamma = bias[:D].reshape(1, D).astype(jnp.float32)
    b_beta = bias[D:].reshape(1, D).astype(jnp.float32)

    if compute_dtype is not None:
        c2 = c2.astype(compute_dtype)
        w_gamma = w_gamma.astype(compute_dtype)
        w_beta = w_beta.astype(compute_dtype)

    if D_pad != D:
        pad = D_pad - D
        x2 = jnp.pad(x2, ((0, 0), (0, pad)))
        c2 = jnp.pad(c2, ((0, 0), (0, pad)))
        w_gamma = jnp.pad(w_gamma, ((0, pad), (0, pad)))
        w_beta = jnp.pad(w_beta, ((0, pad), (0, pad)))
        b_gamma = jnp.pad(b_gamma, ((0, 0), (0, pad)))
        b_beta = jnp.pad(b_beta, ((0, 0), (0, pad)))

    weight_bytes = (
        (w_gamma.size + w_beta.size) * w_gamma.dtype.itemsize
        + (b_gamma.size + b_beta.size) * 4
    )
    tm = _choose_tile_m(
        M, D_pad,
        (x2.dtype.itemsize, c2.dtype.itemsize, x.dtype.itemsize),
        weight_bytes, tile_m)
    grid = (pl.cdiv(M, tm),)

    stream_spec = pl.BlockSpec((tm, D_pad), lambda i: (i, 0))
    # Constant index_map -> DMA'd once; single-buffer so the resident
    # weights/bias don't hold double VMEM.
    w_spec = pl.BlockSpec((D_pad, D_pad), lambda i: (0, 0),
                          pipeline_mode=pl.Buffered(1))
    b_spec = pl.BlockSpec((1, D_pad), lambda i: (0, 0),
                          pipeline_mode=pl.Buffered(1))

    out = pl.pallas_call(
        _film_kernel,
        out_shape=jax.ShapeDtypeStruct((M, D_pad), x.dtype),
        grid_spec=pltpu.PrefetchScalarGridSpec(
            num_scalar_prefetch=0,
            grid=grid,
            in_specs=[stream_spec, stream_spec, w_spec, w_spec, b_spec, b_spec],
            out_specs=pl.BlockSpec((tm, D_pad), lambda i: (i, 0)),
        ),
        compiler_params=pltpu.CompilerParams(
            dimension_semantics=("parallel",),
            vmem_limit_bytes=_VMEM_LIMIT_BYTES,
        ),
    )(x2, c2, w_gamma, w_beta, b_gamma, b_beta)

    if D_pad != D:
        out = out[:, :D]
    return out.reshape(B, T, D)


def film_reference(x, conditioning, weight, bias):
    proj = jnp.einsum("btd,de->bte", conditioning, weight) + bias
    d = x.shape[-1]
    gamma, beta = proj[..., :d], proj[..., d:]
    return gamma * x + beta


if __name__ == "__main__":
    B, T, D = 2, 8, 32  # small shapes; d_model = 32
    key = jax.random.PRNGKey(0)
    kx, kc, kw, kb = jax.random.split(key, 4)

    x = jax.random.normal(kx, (B, T, D), dtype=jnp.float32)
    conditioning = jax.random.normal(kc, (B, T, D), dtype=jnp.float32)

    # Deterministic parameter init mimicking nn.Linear(d_model, 2*d_model):
    # uniform(-1/sqrt(D), 1/sqrt(D)) for both weight and bias.
    bound = 1.0 / (D ** 0.5)
    weight = jax.random.uniform(kw, (D, 2 * D), minval=-bound, maxval=bound,
                                dtype=jnp.float32)
    bias = jax.random.uniform(kb, (2 * D,), minval=-bound, maxval=bound,
                              dtype=jnp.float32)

    ref = film_reference(x, conditioning, weight, bias)

    # f32 path: must match the reference tightly.
    out = jax.block_until_ready(film_forward(x, conditioning, weight, bias))
    assert out.shape == (B, T, D)
    assert jnp.allclose(out, ref, atol=1e-5, rtol=1e-5), "f32 mismatch vs reference"

    # bf16 MXU-operand path (v6e/v7x recommendation): loose-tolerance sanity check.
    out_bf16 = jax.block_until_ready(
        film_forward(x, conditioning, weight, bias, compute_dtype=jnp.bfloat16))
    assert jnp.allclose(out_bf16, ref, atol=5e-2, rtol=5e-2), "bf16 mismatch vs reference"

    print("KERNEL_OK")
</pallas_src>

<mosaic_0001>
module attributes {stable_mosaic.version = 11 : i64} {
  func.func @_film_kernel(%arg0: i32, %arg1: memref<8x128xf32, #tpu.memory_space<vmem>>, %arg2: memref<8x128xf32, #tpu.memory_space<vmem>>, %arg3: memref<128x128xf32, #tpu.memory_space<vmem>>, %arg4: memref<128x128xf32, #tpu.memory_space<vmem>>, %arg5: memref<1x128xf32, #tpu.memory_space<vmem>>, %arg6: memref<1x128xf32, #tpu.memory_space<vmem>>, %arg7: memref<8x128xf32, #tpu.memory_space<vmem>>) attributes {dimension_semantics = [#tpu.dimension_semantics<parallel>], iteration_bounds = array<i64: 2>, scalar_prefetch = 0 : i64, scratch_operands = 0 : i64, tpu.core_type = #tpu.core_type<tc>, window_params = [{transform_indices = @transform_0, window_bounds = array<i64: 8, 128>}, {transform_indices = @transform_1, window_bounds = array<i64: 8, 128>}, {pipeline_mode = #tpu.pipeline_mode<synchronous>, transform_indices = @transform_2, window_bounds = array<i64: 128, 128>}, {pipeline_mode = #tpu.pipeline_mode<synchronous>, transform_indices = @transform_3, window_bounds = array<i64: 128, 128>}, {pipeline_mode = #tpu.pipeline_mode<synchronous>, transform_indices = @transform_4, window_bounds = array<i64: 1, 128>}, {pipeline_mode = #tpu.pipeline_mode<synchronous>, transform_indices = @transform_5, window_bounds = array<i64: 1, 128>}, {transform_indices = @transform_6, window_bounds = array<i64: 8, 128>}]} {
    %c0 = arith.constant 0 : index
    %c0_0 = arith.constant 0 : index
    %0 = vector.load %arg2[%c0, %c0_0] : memref<8x128xf32, #tpu.memory_space<vmem>>, vector<8x128xf32>
    %c0_1 = arith.constant 0 : index
    %c0_2 = arith.constant 0 : index
    %1 = vector.load %arg1[%c0_1, %c0_2] : memref<8x128xf32, #tpu.memory_space<vmem>>, vector<8x128xf32>
    %c0_3 = arith.constant 0 : index
    %c0_4 = arith.constant 0 : index
    %2 = vector.load %arg3[%c0_3, %c0_4] : memref<128x128xf32, #tpu.memory_space<vmem>>, vector<128x128xf32>
    %cst = arith.constant dense<0.000000e+00> : vector<8x128xf32>
    %3 = tpu.matmul %0, %2, %cst {dimension_numbers = #tpu.dot_dimension_numbers<[1], [0], [0], [1], [0, 0, 1, 1], [], []>} : vector<8x128xf32>, vector<128x128xf32>, vector<8x128xf32> -> vector<8x128xf32>
    %c0_5 = arith.constant 0 : index
    %c0_6 = arith.constant 0 : index
    %4 = vector.load %arg4[%c0_5, %c0_6] : memref<128x128xf32, #tpu.memory_space<vmem>>, vector<128x128xf32>
    %cst_7 = arith.constant dense<0.000000e+00> : vector<8x128xf32>
    %5 = tpu.matmul %0, %4, %cst_7 {dimension_numbers = #tpu.dot_dimension_numbers<[1], [0], [0], [1], [0, 0, 1, 1], [], []>} : vector<8x128xf32>, vector<128x128xf32>, vector<8x128xf32> -> vector<8x128xf32>
    %c0_8 = arith.constant 0 : index
    %c0_9 = arith.constant 0 : index
    %6 = vector.load %arg5[%c0_8, %c0_9] : memref<1x128xf32, #tpu.memory_space<vmem>>, vector<1x128xf32>
    %7 = vector.broadcast %6 : vector<1x128xf32> to vector<8x128xf32>
    %8 = arith.addf %3, %7 : vector<8x128xf32>
    %c0_10 = arith.constant 0 : index
    %c0_11 = arith.constant 0 : index
    %9 = vector.load %arg6[%c0_10, %c0_11] : memref<1x128xf32, #tpu.memory_space<vmem>>, vector<1x128xf32>
    %10 = vector.broadcast %9 : vector<1x128xf32> to vector<8x128xf32>
    %11 = arith.addf %5, %10 : vector<8x128xf32>
    %12 = arith.mulf %8, %1 : vector<8x128xf32>
    %13 = arith.addf %12, %11 : vector<8x128xf32>
    %c0_12 = arith.constant 0 : index
    %c0_13 = arith.constant 0 : index
    %14 = vector.load %arg7[%c0_12, %c0_13] : memref<8x128xf32, #tpu.memory_space<vmem>>, vector<8x128xf32>
    tpu.vector_store %arg7[%c0_12, %c0_13], %13 {strides = array<i32>} : memref<8x128xf32, #tpu.memory_space<vmem>>, vector<8x128xf32>,
    return
  }
  func.func @transform_0(%arg0: i32) -> (i32, i32) {
    %c0_i32 = arith.constant 0 : i32
    %c0_i32_0 = arith.constant 0 : i32
    return %arg0, %c0_i32 : i32, i32
  }
  func.func @transform_1(%arg0: i32) -> (i32, i32) {
    %c0_i32 = arith.constant 0 : i32
    %c0_i32_0 = arith.constant 0 : i32
    return %arg0, %c0_i32 : i32, i32
  }
  func.func @transform_2(%arg0: i32) -> (i32, i32) {
    %c0_i32 = arith.constant 0 : i32
    %c0_i32_0 = arith.constant 0 : i32
    %c0_i32_1 = arith.constant 0 : i32
    return %c0_i32, %c0_i32_0 : i32, i32
  }
  func.func @transform_3(%arg0: i32) -> (i32, i32) {
    %c0_i32 = arith.constant 0 : i32
    %c0_i32_0 = arith.constant 0 : i32
    %c0_i32_1 = arith.constant 0 : i32
    return %c0_i32, %c0_i32_0 : i32, i32
  }
  func.func @transform_4(%arg0: i32) -> (i32, i32) {
    %c0_i32 = arith.constant 0 : i32
    %c0_i32_0 = arith.constant 0 : i32
    %c0_i32_1 = arith.constant 0 : i32
    return %c0_i32, %c0_i32_0 : i32, i32
  }
  func.func @transform_5(%arg0: i32) -> (i32, i32) {
    %c0_i32 = arith.constant 0 : i32
    %c0_i32_0 = arith.constant 0 : i32
    %c0_i32_1 = arith.constant 0 : i32
    return %c0_i32, %c0_i32_0 : i32, i32
  }
  func.func @transform_6(%arg0: i32) -> (i32, i32) {
    %c0_i32 = arith.constant 0 : i32
    %c0_i32_0 = arith.constant 0 : i32
    return %arg0, %c0_i32 : i32, i32
  }
}

</mosaic_0001>

<bundles_post_ra>
// kernel: tpu_custom_call.1
= control target key start
LH: loop header
LB: loop body
LE: loop exit
PB: predicated region body
PF: predicated region fallthrough
CT: control target
= control target key end

     0   :  { %s1346_s0 = inlined_call_operand.hbm [shape: f32[16,128], index: 0, kind: input, shape index: {}]   ;;  %s1347_s1 = inlined_call_operand.hbm [shape: f32[16,128], index: 1, kind: input, shape index: {}]   ;;  %s1348_s2 = inlined_call_operand.hbm [shape: f32[128,128], index: 2, kind: input, shape index: {}]   ;;  %s1349_s3 = inlined_call_operand.hbm [shape: f32[128,128], index: 3, kind: input, shape index: {}]   ;;  %s1350_s4 = inlined_call_operand.vmem [shape: f32[1,128], index: 4, kind: input, shape index: {}]   ;;  %s1351_s5 = inlined_call_operand.vmem [shape: f32[1,128], index: 5, kind: input, shape index: {}]   ;;  %s1352_s6 = inlined_call_operand.hbm [shape: f32[16,128], index: 6, kind: output, shape index: {}]  }
   0x1   :  { %1357 = sst [smem:[#allocation17_spill]] %s1348_s2 }
   0x2   :  { %1358 = sst [smem:[#allocation18_spill]] %s1349_s3 }
   0x3   :  { %11 = vsyncpa [#allocation3], 0 }
   0x4   :  { %13 = vsyncpa [#allocation3 + $0x1], 0 }
   0x5   :  { %14 = vsyncpa [#allocation6], 0 }
   0x6   :  { %16 = vsyncpa [#allocation6 + $0x1], 0 }
   0x7   :  { %17 = vsyncpa [#allocation9], 0 }
   0x8   :  { %18 = vsyncpa [#allocation4], 0 }
   0x9   :  { %20 = vsyncpa [#allocation4 + $0x1], 0  ;;  %s1081_s21 = smov 0   ;;  %s1083_s22 = smov 0  }
   0xa   :  { %s1085_s23 = smov 0   ;;  %s1087_s24 = smov 0  }
   0xb LB: > { %s1102_s25 = sadd.s32 4294967295, %s1035_s24   ;;  %s650_s26 = sadd.s32 4294967294, %s1035_s24   ;;  %s1035_s24 = sphi %s1087_s24, %s1382_s24   ;;  %s1031_s23 = sphi %s1085_s23, %s1381_s23   ;;  %s1027_s22 = sphi %s1083_s22, %s1380_s22   ;;  %s1023_s21 = sphi %s1081_s21, %s1379_s21  }
   0xc   : > { %p46_p0 = scmp.ne.s32.totalorder %s1027_s22, %s1023_s21  ;;  %p1353_p1 = scmp.eq.s32.totalorder %s1102_s25, 0 }
   0xd   : > { %p186_p3 = scmp.eq.s32.totalorder %s650_s26, 1  ;;  %p651_p5 = scmp.ge.s32.totalorder %s1035_s24, 1 }
   0xe   : > { %p1111_p4 = por %p1353_p1, %p46_p0  ;;  %p193_p7 = scmp.lt.s32.totalorder %s1035_s24, 3 }
   0xf   : > { %p1116_p6 = por %p186_p3, %p46_p0  ;;  %s1037_s30 = smov [#allocation7]  }
  0x10   : > { %s1359_s27 = scalar_select %p1111_p4, 1, 0 }
  0x11   : > { %s1360_s28 = scalar_select %p1116_p6, 1, 0 }
  0x12   : > { %p1121_p8 = pnand %p651_p5, %p193_p7  ;;  %s205_s7 = sshll.u32 %s1037_s30, 4  ;;  %s206_s7 = int_to_ptr.vmem [resolvable:$true] %s205_s7 }
  0x13   : > { %s1038_s9 = smov [#allocation8]   ;;  %s862_s11 = scalar_lea.vmem %s206_s7, 2048 }
  0x14   : > { %s1361_s29 = scalar_select %p1121_p8, 1, 0 }
  0x15   : > { %p789_p9 = pneg %p1121_p8  ;;  %s218_s10 = sshll.u32 %s1038_s9, 4  ;;  %s219_s10 = int_to_ptr.vmem [resolvable:$true] %s218_s10 }
  0x16   : > { %p863_p13 = scmp.ne.s32.totalorder %s206_s7, %s862_s11  ;;  %p870_p5 = scmp.lt.s32.totalorder %s206_s7, %s206_s7 }
  0x17   : > { %p1130_p11 = pnand %p789_p9, %p1353_p1  ;;  %p871_p7 = scmp.lt.s32.totalorder %s862_s11, %s862_s11 }
  0x19   : > { %p853_p12 = pneg %p1130_p11  ;;  %p872_p10 = por %p871_p7, %p870_p5 }
  0x1b   : > { %p865_p0 = pnand %p863_p13, %p853_p12 }
  0x1d   : > { %p866_p3 = pneg %p865_p0 }
  0x1f   : > { %p873_p9 = pnand %p872_p10, %p866_p3 }
  0x21   : > { %876 = shalt.err (!%p873_p9)
}
  0x22   : > { %s1039_s12 = smov 128   ;;  %s1040_s13 = smov 8  }
  0x23   : > { %s1363_s2 = sld [smem:[#allocation17_spill]]  ;;  %s888_s16 = scalar_lea.vmem %s219_s10, 2048 }
  0x24   : > { %p889_p1 = scmp.ne.s32.totalorder %s219_s10, %s888_s16  ;;  %p896_p2 = scmp.lt.s32.totalorder %s219_s10, %s219_s10 }
  0x25   : > { %p897_p6 = scmp.lt.s32.totalorder %s888_s16, %s888_s16 }
  0x26   : > { %p891_p13 = pnand %p889_p1, %p853_p12 }
  0x27   : > { %p898_p5 = por %p897_p6, %p896_p2 }
  0x28   : > { %p892_p0 = pneg %p891_p13 }
  0x29   : > { %792 = dma.hbm_to_vmem [thread:$0]  (!%p1130_p11), %s1363_s2, 2048, %s206_s7, [#allocation6], %s1039_s12, %s1039_s12, %s1040_s13  }
  0x2a   : > { %p899_p10 = pnand %p898_p5, %p892_p0 }
  0x2c   : > { %902 = shalt.err (!%p899_p10)
}
  0x2d   : > { %s1364_s3 = sld [smem:[#allocation18_spill]]  ;;  %s1153_s19 = sadd.s32 1, %s1035_s24  }
  0x2e   : > { %s33_s20 = sadd.s32 1, %s1031_s23  ;;  %s30_s26 = ssub.s32 %s1035_s24, %s1153_s19 }
  0x2f   : > { %p40_p1 = scmp.ne.s32.totalorder %s1031_s23, %s1027_s22  ;;  %p31_p2 = scmp.eq.s32.totalorder %s30_s26, 0 }
  0x30   : > { %p41_p6 = scmp.eq.s32.totalorder %s1035_s24, 0  ;;  %p1365_p12 = scmp.eq.s32.totalorder %s1102_s25, 1 }
  0x31   : > { %p809_p7 = scmp.lt.s32.totalorder %s1035_s24, 2  ;;  %s238_s8 = sand.u32 1, %s1031_s23  }
  0x32   : > { %p1163_p3 = por %p1365_p12, %p40_p1  ;;  %p42_p9 = por %p41_p6, %p40_p1 }
  0x33   : > { %795 = dma.hbm_to_vmem [thread:$0]  (!%p1130_p11), %s1364_s3, 2048, %s219_s10, [#allocation9], %s1039_s12, %s1039_s12, %s1040_s13  }
  0x34   : > { %s1366_s30 = scalar_select %p1163_p3, 1, 0 }
  0x35   : > { %s1169_s7 = scalar_select %p31_p2, %s1031_s23, %s33_s20  }
  0x36   : > { %s1172_s9 = sshll.u32 %s238_s8, 3  ;;  %s656_s10 = sshll.u32 %s1035_s24, 7 }
  0x37   : > { %1367 = sst [smem:[#allocation16_spill]] %s1169_s7  ;;  %s1178_s13 = scalar_lea.hbm %s1346_s0, %s656_s10 }
  0x38   : > { %s242_s14 = scalar_lea.vmem [#allocation2], %s1172_s9  ;;  %p1183_p11 = pnand %p809_p7, %p42_p9 }
  0x39   : > { %s249_s15 = sshll.u32 %s242_s14, 4  ;;  %s1190_s20 = scalar_lea.hbm %s1347_s1, %s656_s10  ;;  %s1181_s15 = int_to_ptr.vmem [resolvable:$true] %s249_s15 }
  0x3a   : > { %s256_s26 = sand.u32 1, %s1035_s24   ;;  %s239_s11 = scalar_lea.sflag [#allocation3], %s238_s8 }
  0x3b   : > { %s903_s12 = scalar_lea.hbm %s1178_s13, 128  ;;  %p905_p0 = pneg %p1183_p11 }
  0x3c   : > { %p904_p13 = scmp.ne.s32.totalorder %s1178_s13, %s903_s12  ;;  %s908_s3 = scalar_lea.hbm %s1346_s0, 256 }
  0x3d   : > { %p909_p1 = scmp.lt.s32.totalorder %s1178_s13, %s1346_s0  ;;  %p910_p2 = scmp.lt.s32.totalorder %s908_s3, %s903_s12 }
  0x3e   : > { %p906_p5 = pnand %p905_p0, %p904_p13 }
  0x3f   : > { %p911_p6 = por %p910_p2, %p909_p1 }
  0x40   : > { %p907_p10 = pneg %p906_p5 }
  0x42   : > { %p912_p12 = pnand %p911_p6, %p907_p10 }
  0x44   : > { %915 = shalt.err (!%p912_p12)
}
  0x45   : > { %s916_s8 = scalar_lea.vmem %s1181_s15, 128  ;;  %s1041_s2 = smov [#allocation2]  }
  0x46   : > { %p917_p7 = scmp.ne.s32.totalorder %s1181_s15, %s916_s8  ;;  %s921_s10 = sshll.u32 %s1041_s2, 4  ;;  %s922_s10 = int_to_ptr.vmem [resolvable:$false] %s921_s10 }
  0x47   : > { %s923_s18 = scalar_lea.vmem %s922_s10, 256  ;;  %p924_p5 = scmp.lt.s32.totalorder %s1181_s15, %s922_s10 }
  0x48   : > { %p919_p9 = pnand %p917_p7, %p905_p0  ;;  %p925_p3 = scmp.lt.s32.totalorder %s923_s18, %s916_s8 }
  0x4a   : > { %p920_p13 = pneg %p919_p9  ;;  %p926_p4 = por %p925_p3, %p924_p5 }
  0x4c   : > { %p927_p1 = pnand %p926_p4, %p920_p13 }
  0x4e   : > { %930 = shalt.err (!%p927_p1)
}
  0x4f   : > { %799 = dma.hbm_to_vmem [thread:$0]  (!%p1183_p11), %s1178_s13, 128, %s1181_s15, %s239_s11  }
  0x50   : > { %s260_s3 = scalar_lea.vmem [#allocation5], %s1172_s9  ;;  %s257_s12 = scalar_lea.sflag [#allocation6], %s256_s26 }
  0x51   : > { %s267_s7 = sshll.u32 %s260_s3, 4  ;;  %s931_s14 = scalar_lea.hbm %s1190_s20, 128  ;;  %s268_s7 = int_to_ptr.vmem [resolvable:$true] %s267_s7 }
  0x52   : > { %p932_p3 = scmp.ne.s32.totalorder %s1190_s20, %s931_s14  ;;  %s936_s2 = scalar_lea.hbm %s1347_s1, 256 }
  0x53   : > { %p937_p2 = scmp.lt.s32.totalorder %s1190_s20, %s1347_s1  ;;  %p938_p6 = scmp.lt.s32.totalorder %s936_s2, %s931_s14 }
  0x54   : > { %p934_p4 = pnand %p932_p3, %p905_p0 }
  0x55   : > { %p939_p12 = por %p938_p6, %p937_p2 }
  0x56   : > { %p935_p10 = pneg %p934_p4 }
  0x58   : > { %p940_p7 = pnand %p939_p12, %p935_p10 }
  0x5a   : > { %943 = shalt.err (!%p940_p7)
}
  0x5b   : > { %s944_s9 = scalar_lea.vmem %s268_s7, 128  ;;  %s1042_s13 = smov [#allocation5]  }
  0x5c   : > { %p945_p9 = scmp.ne.s32.totalorder %s268_s7, %s944_s9  ;;  %s949_s15 = sshll.u32 %s1042_s13, 4  ;;  %s950_s15 = int_to_ptr.vmem [resolvable:$false] %s949_s15 }
  0x5d   : > { %s951_s26 = scalar_lea.vmem %s950_s15, 256  ;;  %p952_p1 = scmp.lt.s32.totalorder %s268_s7, %s950_s15 }
  0x5e   : > { %p947_p13 = pnand %p945_p9, %p905_p0  ;;  %p953_p3 = scmp.lt.s32.totalorder %s951_s26, %s944_s9 }
  0x60   : > { %p948_p5 = pneg %p947_p13  ;;  %p954_p4 = por %p953_p3, %p952_p1 }
  0x62   : > { %p955_p8 = pnand %p954_p4, %p948_p5 }
  0x64   : > { %958 = shalt.err (!%p955_p8)
}
  0x65   : > { %802 = dma.hbm_to_vmem [thread:$0]  (!%p1183_p11), %s1190_s20, 128, %s268_s7, %s257_s12  }
  0x66   : > { %p1369_p10 = scmp.ne.s32.totalorder %s1361_s29, 0 }
  0x67   : > { %s1241_s11 = sand.u32 (!%p1369_p10), 1, %s1027_s22   ;;  %p1370_p0 = scmp.ne.s32.totalorder (!%p1369_p10), %s1359_s27, 0 }
  0x68   : > { %276 = sbr.rel (%p1369_p10) target bundleno = 365 (0x16d), region = 44  ;;  %s1244_s3 = sshll.u32 (!%p1369_p10), %s1241_s11, 3 }
  0x69   : > { %s279_s14 = scalar_lea.sflag (!%p1369_p10), [#allocation3], %s1241_s11  ;;  %s282_s17 = scalar_lea.vmem (!%p1369_p10), [#allocation2], %s1244_s3 }
  0x6d   : > { %1002 = dma.done.wait (%p1370_p0), %s279_s14, 128  }
  0x6e   : > { %1004 = vsyncadd (%p1370_p0), %s279_s14, 4294967168  ;;  %s287_s29 = sand.u32 1, %s1102_s25   ;;  %s291_s20 = scalar_lea.vmem [#allocation5], %s1244_s3 }
  0x6f   : > { %s288_s16 = scalar_lea.sflag [#allocation6], %s287_s29 }
  0x70   : > { %1006 = dma.done.wait (%p1370_p0), %s288_s16, 128  }
  0x71   : > { %1008 = vsyncadd (%p1370_p0), %s288_s16, 4294967168  ;;  %p1371_p8 = scmp.eq.s32.totalorder %s1102_s25, 0 }
  0x73   : > { %1010 = dma.done.wait (%p1371_p8), [#allocation6], 2048   ;;  %p1372_p11 = pmov %p1371_p8 }
  0x74   : > { %p1373_p2 = pmov %p1371_p8 }
  0x75   : > { %1012 = vsyncadd (%p1372_p11), [#allocation6], 4294965248 }
  0x76   : > { %1014 = dma.done.wait (%p1373_p2), [#allocation9], 2048   ;;  %p1374_p6 = pmov %p1373_p2 }
  0x77   : > { %v1043_v0 = vmov 0.0   ;;  %vm1044_vm0 = vmmov 0   ;;  %v350_v1 = vld [vmem:[#allocation7 + $0x78] sm:$0xff]  ;;  %v349_v3 = vld [vmem:[#allocation7 + $0x70] sm:$0xff]  ;;  %v348_v5 = vld [vmem:[#allocation7 + $0x68] sm:$0xff]  ;;  %s668_s2 = sshll.u32 %s1102_s25, 7 }
  0x78   : > { %1016 = vsyncadd (%p1374_p6), [#allocation9], 4294965248  ;;  %705 = vmatprep.subr.mxu0 %v1043_v0  ;;  %740 = vmatprep.subr.mxu1 %v1043_v0  ;;  %v366_v2 = vld [vmem:[#allocation8 + $0x78] sm:$0xff]  ;;  %v365_v4 = vld [vmem:[#allocation8 + $0x70] sm:$0xff]  ;;  %s332_s10 = scalar_lea.vmem [#allocation10], %s1244_s3  ;;  %s536_s15 = scalar_lea.hbm %s1352_s6, %s668_s2 }
  0x79   : > { %737 = vmatprep.mubr.msk.f32.mxu0 %vm1044_vm0, %v1043_v0  ;;  %772 = vmatprep.mubr.msk.f32.mxu1 %vm1044_vm0, %v1043_v0  ;;  %v364_v6 = vld [vmem:[#allocation8 + $0x68] sm:$0xff]  ;;  %v347_v7 = vld [vmem:[#allocation7 + $0x60] sm:$0xff]  ;;  %v346_v9 = vld [vmem:[#allocation7 + $0x58] sm:$0xff]  ;;  %s538_s18 = sshll.u32 %s332_s10, 4  ;;  %s525_s26 = scalar_lea.sflag [#allocation4], %s1241_s11  ;;  %s539_s18 = int_to_ptr.vmem [resolvable:$true] %s538_s18 }
  0x7a   : > { %706 = vmatpush3.msra.mxu0 %v350_v1  ;;  %741 = vmatpush3.msra.mxu1 %v366_v2  ;;  %v363_v8 = vld [vmem:[#allocation8 + $0x60] sm:$0xff]  ;;  %v362_v10 = vld [vmem:[#allocation8 + $0x58] sm:$0xff]  ;;  %v345_v11 = vld [vmem:[#allocation7 + $0x50] sm:$0xff]  ;;  %s959_s14 = scalar_lea.vmem %s539_s18, 128  ;;  %p1375_p7 = scmp.ne.s32.totalorder %s1366_s30, 0 }
  0x7b   : > { %707 = vmatprep.subr.mxu0 %v1043_v0  ;;  %742 = vmatprep.subr.mxu1 %v1043_v0  ;;  %v361_v12 = vld [vmem:[#allocation8 + $0x50] sm:$0xff]  ;;  %v344_v13 = vld [vmem:[#allocation7 + $0x48] sm:$0xff]  ;;  %v343_v15 = vld [vmem:[#allocation7 + $0x40] sm:$0xff]  ;;  %p960_p12 = scmp.ne.s32.totalorder %s539_s18, %s959_s14 }
  0x7c   : > { %708 = vmatpush3.msra.mxu0 %v349_v3  ;;  %743 = vmatpush3.msra.mxu1 %v365_v4  ;;  %v360_v14 = vld [vmem:[#allocation8 + $0x48] sm:$0xff]  ;;  %v359_v16 = vld [vmem:[#allocation8 + $0x40] sm:$0xff]  ;;  %v342_v17 = vld [vmem:[#allocation7 + $0x38] sm:$0xff] }
  0x7d   : > { %709 = vmatprep.subr.mxu0 %v1043_v0  ;;  %744 = vmatprep.subr.mxu1 %v1043_v0  ;;  %v358_v18 = vld [vmem:[#allocation8 + $0x38] sm:$0xff]  ;;  %v341_v19 = vld [vmem:[#allocation7 + $0x30] sm:$0xff]  ;;  %v340_v21 = vld [vmem:[#allocation7 + $0x28] sm:$0xff]  ;;  %p961_p9 = pnand %p960_p12, %p1375_p7 }
  0x7e   : > { %710 = vmatpush3.msra.mxu0 %v348_v5  ;;  %745 = vmatpush3.msra.mxu1 %v364_v6  ;;  %v357_v20 = vld [vmem:[#allocation8 + $0x30] sm:$0xff]  ;;  %v356_v22 = vld [vmem:[#allocation8 + $0x28] sm:$0xff]  ;;  %v339_v23 = vld [vmem:[#allocation7 + $0x20] sm:$0xff] }
  0x7f   : > { %711 = vmatprep.subr.mxu0 %v1043_v0  ;;  %746 = vmatprep.subr.mxu1 %v1043_v0  ;;  %v355_v24 = vld [vmem:[#allocation8 + $0x20] sm:$0xff]  ;;  %v338_v25 = vld [vmem:[#allocation7 + $0x18] sm:$0xff]  ;;  %v337_v27 = vld [vmem:[#allocation7 + $0x10] sm:$0xff]  ;;  %p962_p13 = pneg %p961_p9 }
  0x80   : > { %712 = vmatpush3.msra.mxu0 %v347_v7  ;;  %747 = vmatpush3.msra.mxu1 %v363_v8  ;;  %v354_v26 = vld [vmem:[#allocation8 + $0x18] sm:$0xff]  ;;  %v353_v28 = vld [vmem:[#allocation8 + $0x10] sm:$0xff]  ;;  %v336_v29 = vld [vmem:[#allocation7 + $0x8] sm:$0xff] }
  0x81   : > { %713 = vmatprep.subr.mxu0 %v1043_v0  ;;  %748 = vmatprep.subr.mxu1 %v1043_v0  ;;  %v352_v30 = vld [vmem:[#allocation8 + $0x8] sm:$0xff]  ;;  %v335_v31 = vld [vmem:[#allocation7] sm:$0xff]  ;;  %v333_v33 = vld [vmem:[%s291_s20] sm:$0xff] }
  0x82   : > { %714 = vmatpush3.msra.mxu0 %v346_v9  ;;  %749 = vmatpush3.msra.mxu1 %v362_v10  ;;  %v351_v32 = vld [vmem:[#allocation8] sm:$0xff] }
  0x83   : > { %715 = vmatprep.subr.mxu0 %v1043_v0  ;;  %750 = vmatprep.subr.mxu1 %v1043_v0  ;;  %v665_v34 = vld [vmem:[%s1350_s4] ss:$0 sm:$0xff] }
  0x84   : > { %716 = vmatpush3.msra.mxu0 %v345_v11  ;;  %751 = vmatpush3.msra.mxu1 %v361_v12  ;;  %v666_v35 = vld [vmem:[%s1351_s5] ss:$0 sm:$0xff] }
  0x85   : > { %717 = vmatprep.subr.mxu0 %v1043_v0  ;;  %752 = vmatprep.subr.mxu1 %v1043_v0  ;;  %v334_v36 = vld [vmem:[%s282_s17] sm:$0xff]  ;;  %s1045_s17 = smov [#allocation10]  }
  0x86   : > { %718 = vmatpush3.msra.mxu0 %v344_v13  ;;  %753 = vmatpush3.msra.mxu1 %v360_v14  ;;  %s963_s29 = sshll.u32 %s1045_s17, 4  ;;  %s964_s29 = int_to_ptr.vmem [resolvable:$false] %s963_s29 }
  0x87   : > { %719 = vmatprep.subr.mxu0 %v1043_v0  ;;  %754 = vmatprep.subr.mxu1 %v1043_v0  ;;  %s965_s25 = scalar_lea.vmem %s964_s29, 256  ;;  %p966_p5 = scmp.lt.s32.totalorder %s539_s18, %s964_s29 }
  0x88   : > { %720 = vmatpush3.msra.mxu0 %v343_v15  ;;  %755 = vmatpush3.msra.mxu1 %v359_v16  ;;  %p967_p1 = scmp.lt.s32.totalorder %s965_s25, %s959_s14 }
  0x89   : > { %721 = vmatprep.subr.mxu0 %v1043_v0  ;;  %756 = vmatprep.subr.mxu1 %v1043_v0 }
  0x8a   : > { %722 = vmatpush3.msra.mxu0 %v342_v17  ;;  %757 = vmatpush3.msra.mxu1 %v358_v18  ;;  %p968_p3 = por %p967_p1, %p966_p5 }
  0x8b   : > { %723 = vmatprep.subr.mxu0 %v1043_v0  ;;  %758 = vmatprep.subr.mxu1 %v1043_v0 }
  0x8c   : > { %724 = vmatpush3.msra.mxu0 %v341_v19  ;;  %759 = vmatpush3.msra.mxu1 %v357_v20  ;;  %p969_p4 = pnand %p968_p3, %p962_p13 }
  0x8d   : > { %725 = vmatprep.subr.mxu0 %v1043_v0  ;;  %760 = vmatprep.subr.mxu1 %v1043_v0 }
  0x8e   : > { %726 = vmatpush3.msra.mxu0 %v340_v21  ;;  %761 = vmatpush3.msra.mxu1 %v356_v22 }
  0x8f   : > { %727 = vmatprep.subr.mxu0 %v1043_v0  ;;  %762 = vmatprep.subr.mxu1 %v1043_v0 }
  0x90   : > { %728 = vmatpush3.msra.mxu0 %v339_v23  ;;  %763 = vmatpush3.msra.mxu1 %v355_v24 }
  0x91   : > { %729 = vmatprep.subr.mxu0 %v1043_v0  ;;  %764 = vmatprep.subr.mxu1 %v1043_v0 }
  0x92   : > { %730 = vmatpush3.msra.mxu0 %v338_v25  ;;  %765 = vmatpush3.msra.mxu1 %v354_v26 }
  0x93   : > { %731 = vmatprep.subr.mxu0 %v1043_v0  ;;  %766 = vmatprep.subr.mxu1 %v1043_v0 }
  0x94   : > { %732 = vmatpush3.msra.mxu0 %v337_v27  ;;  %767 = vmatpush3.msra.mxu1 %v353_v28 }
  0x95   : > { %733 = vmatprep.subr.mxu0 %v1043_v0  ;;  %768 = vmatprep.subr.mxu1 %v1043_v0 }
  0x96   : > { %734 = vmatpush3.msra.mxu0 %v336_v29  ;;  %769 = vmatpush3.msra.mxu1 %v352_v30 }
  0x97   : > { %735 = vmatprep.subr.mxu0 %v1043_v0  ;;  %770 = vmatprep.subr.mxu1 %v1043_v0 }
  0x98   : > { %736 = vmatpush3.msra.mxu0 %v335_v31  ;;  %771 = vmatpush3.msra.mxu1 %v351_v32 }
  0x99   : > { %738 = vmatmul.mubr.f32.vlgmr.msra.gmra.mxu0 %v333_v33  ;;  %773 = vmatmul.mubr.f32.vlgmr.msra.gmra.mxu1 %v333_v33 }
 0x159   : > { %v440_v37 = vpop.f32.mrf.mxu0  ;;  %v517_v38 = vpop.f32.mrf.mxu1 }
 0x15a   : > { %v441_v39 = vadd.f32 %v665_v34, %v440_v37  ;;  %v518_v40 = vadd.f32 %v666_v35, %v517_v38 }
 0x15b   : > { %v739_v41 = vpop.f32.mrf.mxu0  ;;  %v774_v42 = vpop.f32.mrf.mxu1 }
 0x15c   : > { %v521_v43 = vmul.f32 %v441_v39, %v334_v36 }
 0x15e   : > { %v522_v44 = vadd.f32 %v521_v43, %v518_v40 }
 0x160   : > { %523 = vst [vmem:[%s332_s10] sm:$0xff] %v522_v44 }
 0x161   : > { %972 = shalt.err (!%p969_p4)
}
 0x162   : > { %s973_s3 = scalar_lea.hbm %s536_s15, 128  ;;  %s977_s20 = scalar_lea.hbm %s1352_s6, 256 }
 0x163   : > { %p974_p10 = scmp.ne.s32.totalorder %s536_s15, %s973_s3  ;;  %p978_p11 = scmp.lt.s32.totalorder %s536_s15, %s1352_s6 }
 0x164   : > { %p979_p2 = scmp.lt.s32.totalorder %s977_s20, %s973_s3 }
 0x165   : > { %p975_p0 = pnand %p974_p10, %p1375_p7 }
 0x166   : > { %p980_p6 = por %p979_p2, %p978_p11 }
 0x167   : > { %p976_p8 = pneg %p975_p0 }
 0x169   : > { %p981_p12 = pnand %p980_p6, %p976_p8 }
 0x16b   : > { %984 = shalt.err (!%p981_p12)
}
 0x16c   : > { %787 = dma.vmem_to_hbm [thread:$0]  (%p1375_p7), %s539_s18, 128, %s536_s15, %s525_s26  }
 0x16d PF: > { %s550_s12 = sand.u32 1, %s1023_s21   ;;  %p1376_p9 = scmp.ne.s32.totalorder %s1360_s28, 0 }
 0x16e   : > { %p1377_p13 = scmp.ge.s32.totalorder %s1035_s24, 2  ;;  %s551_s8 = scalar_lea.sflag [#allocation4], %s550_s12 }
 0x170   : > { %p804_p5 = pnand %p1377_p13, %p1376_p9 }
 0x172   : > { %p805_p1 = pneg %p804_p5 }
 0x174   : > { %1018 = dma.done.wait (%p805_p1), %s551_s8, 128  }
 0x175   : > { %1020 = vsyncadd (%p805_p1), %s551_s8, 4294967168  ;;  %s1378_s2 = sld [smem:[#allocation16_spill]]  ;;  %p23_p3 = scmp.ge.s32.totalorder %s1153_s19, 4  }
 0x176   : > { %s1379_s21 = smov %s1027_s22  ;;  %s1380_s22 = smov %s1031_s23 }
 0x177   : > { %s1382_s24 = smov %s1153_s19  ;;  %25 = sbr.rel (!%p23_p3) target bundleno = 11 (0xb), region = 110 }
 0x17b   : > { %s1381_s23 = smov %s1378_s2 }
 0x17c   :  { %556 = vsyncpa [#allocation3], 1 }
 0x17d   :  { %558 = vsyncpa [#allocation3 + $0x1], 1 }
 0x17e   :  { %559 = vsyncpa [#allocation6], 1 }
 0x17f   :  { %561 = vsyncpa [#allocation6 + $0x1], 1 }
 0x180   :  { %562 = vsyncpa [#allocation9], 1 }
 0x181   :  { %563 = vsyncpa [#allocation4], 1 }
 0x182   :  { %565 = vsyncpa [#allocation4 + $0x1], 1 }

</bundles_post_ra>
